<compile_context>
chip_gen: v7x
topology: tpu7x:2x2x1
jax: 0.10.0
libtpu: 0.0.40
codegen_flags: <defaults>
</compile_context>

<pallas_src>
import jax
import jax.numpy as jnp
from jax.experimental import pallas as pl
from jax.experimental.pallas import tpu as pltpu

P_DROP = 0.2
LANES = 128                                   # lane-padded width for every dim
_DROP_THRESHOLD = int(P_DROP * (1 << 32))     # keep element iff bits >= threshold


def _mlp_kernel(x_ref, bits_ref, w1_ref, b1_ref, w2_ref, b2_ref, w3_ref, b3_ref,
                o_ref):
    # One batch tile per grid step; weights/biases stay resident in VMEM.
    x = x_ref[...]                                                    # [TB, 128] f32

    # fc1 + relu (fused add+max epilogue)
    h1 = jnp.maximum(
        jnp.dot(x, w1_ref[...], preferred_element_type=jnp.float32) + b1_ref[...],
        0.0)

    # fc2 + relu
    h2 = jnp.maximum(
        jnp.dot(h1, w2_ref[...], preferred_element_type=jnp.float32) + b2_ref[...],
        0.0)

    # dropout(p=0.2): integer-threshold compare on raw uint32 bits, inverted scaling.
    keep = bits_ref[...] >= _DROP_THRESHOLD
    h2 = jnp.where(keep, h2 * (1.0 / (1.0 - P_DROP)), 0.0)

    # fc3 (logits, no activation) -> lane-dense [TB, 128] store
    o_ref[...] = (
        jnp.dot(h2, w3_ref[...], preferred_element_type=jnp.float32) + b3_ref[...])


def _round_up(n, m):
    return ((n + m - 1) // m) * m


@jax.jit
def iris_classifier_forward(x, params, dropout_key):
    """x: [B, 4] float32.  params: lane-padded [128,128] weights / [1,128] biases.

    Returns logits [B, 3] float32.
    """
    B, F = x.shape
    n_out = 3

    # Batch tiling: a single padded tile for small B, 1024-row tiles for large B.
    TB_MAX = 1024
    tb = max(8, _round_up(B, 8)) if B <= TB_MAX else TB_MAX
    b_pad = _round_up(B, tb)

    # Lane/sublane-pad inputs to vreg-native shapes (zero columns stay zero through
    # matmul / relu / dropout, so the padded math is exact).
    x_pad = jnp.pad(x.astype(jnp.float32), ((0, b_pad - B), (0, LANES - F)))
    bits = jax.random.bits(dropout_key, (b_pad, LANES), dtype=jnp.uint32)

    row_spec = pl.BlockSpec((tb, LANES), lambda i: (i, 0))     # x / bits / out tiles
    w_spec = pl.BlockSpec((LANES, LANES), lambda i: (0, 0))    # resident weights
    b_spec = pl.BlockSpec((1, LANES), lambda i: (0, 0))        # resident biases

    out_pad = pl.pallas_call(
        _mlp_kernel,
        out_shape=jax.ShapeDtypeStruct((b_pad, LANES), jnp.float32),
        grid=(b_pad // tb,),
        in_specs=[
            row_spec,            # x
            row_spec,            # dropout bits
            w_spec, b_spec,      # fc1
            w_spec, b_spec,      # fc2
            w_spec, b_spec,      # fc3
        ],
        out_specs=row_spec,
        compiler_params=pltpu.CompilerParams(
            dimension_semantics=("parallel",)),   # shards batch tiles across v7x TCs
    )(x_pad, bits, params["w1"], params["b1"], params["w2"], params["b2"],
      params["w3"], params["b3"])

    return out_pad[:B, :n_out]


def init_params(key):
    """nn.Linear-style init U(-1/sqrt(fan_in), 1/sqrt(fan_in)), stored transposed
    ([in, out]) and zero-padded to lane-dense [128, 128] / [1, 128] shapes."""
    dims = [(4, 10), (10, 10), (10, 3)]
    params = {}
    for i, (fan_in, fan_out) in enumerate(dims, start=1):
        key, kw, kb = jax.random.split(key, 3)
        bound = 1.0 / (fan_in ** 0.5)
        w = jax.random.uniform(kw, (fan_in, fan_out), jnp.float32,
                               minval=-bound, maxval=bound)
        b = jax.random.uniform(kb, (fan_out,), jnp.float32,
                               minval=-bound, maxval=bound)
        params[f"w{i}"] = jnp.zeros((LANES, LANES), jnp.float32).at[:fan_in, :fan_out].set(w)
        params[f"b{i}"] = jnp.zeros((1, LANES), jnp.float32).at[0, :fan_out].set(b)
    return params


if __name__ == "__main__":
    key = jax.random.PRNGKey(0)
    k_params, k_x, k_drop = jax.random.split(key, 3)

    params = init_params(k_params)

    batch = 8
    x = jax.random.normal(k_x, (batch, 4), dtype=jnp.float32)

    logits = iris_classifier_forward(x, params, k_drop)
    jax.block_until_ready(logits)

    assert logits.shape == (batch, 3)
    assert logits.dtype == jnp.float32
    print("KERNEL_OK")
</pallas_src>

<mosaic_0001>
module attributes {stable_mosaic.version = 11 : i64} {
  func.func @_mlp_kernel(%arg0: i32, %arg1: memref<8x128xf32, #tpu.memory_space<vmem>>, %arg2: memref<8x128xi32, #tpu.memory_space<vmem>>, %arg3: memref<128x128xf32, #tpu.memory_space<vmem>>, %arg4: memref<1x128xf32, #tpu.memory_space<vmem>>, %arg5: memref<128x128xf32, #tpu.memory_space<vmem>>, %arg6: memref<1x128xf32, #tpu.memory_space<vmem>>, %arg7: memref<128x128xf32, #tpu.memory_space<vmem>>, %arg8: memref<1x128xf32, #tpu.memory_space<vmem>>, %arg9: memref<8x128xf32, #tpu.memory_space<vmem>>) attributes {dimension_semantics = [#tpu.dimension_semantics<parallel>], iteration_bounds = array<i64: 1>, scalar_prefetch = 0 : i64, scratch_operands = 0 : i64, tpu.core_type = #tpu.core_type<tc>, window_params = [{transform_indices = @transform_0, window_bounds = array<i64: 8, 128>}, {transform_indices = @transform_1, window_bounds = array<i64: 8, 128>}, {pipeline_mode = #tpu.pipeline_mode<synchronous>, transform_indices = @transform_2, window_bounds = array<i64: 128, 128>}, {pipeline_mode = #tpu.pipeline_mode<synchronous>, transform_indices = @transform_3, window_bounds = array<i64: 1, 128>}, {pipeline_mode = #tpu.pipeline_mode<synchronous>, transform_indices = @transform_4, window_bounds = array<i64: 128, 128>}, {pipeline_mode = #tpu.pipeline_mode<synchronous>, transform_indices = @transform_5, window_bounds = array<i64: 1, 128>}, {pipeline_mode = #tpu.pipeline_mode<synchronous>, transform_indices = @transform_6, window_bounds = array<i64: 128, 128>}, {pipeline_mode = #tpu.pipeline_mode<synchronous>, transform_indices = @transform_7, window_bounds = array<i64: 1, 128>}, {transform_indices = @transform_8, window_bounds = array<i64: 8, 128>}]} {
    %c0 = arith.constant 0 : index
    %c0_0 = arith.constant 0 : index
    %0 = vector.load %arg1[%c0, %c0_0] : memref<8x128xf32, #tpu.memory_space<vmem>>, vector<8x128xf32>
    %c0_1 = arith.constant 0 : index
    %c0_2 = arith.constant 0 : index
    %1 = vector.load %arg3[%c0_1, %c0_2] : memref<128x128xf32, #tpu.memory_space<vmem>>, vector<128x128xf32>
    %cst = arith.constant dense<0.000000e+00> : vector<8x128xf32>
    %2 = tpu.matmul %0, %1, %cst {dimension_numbers = #tpu.dot_dimension_numbers<[1], [0], [0], [1], [0, 0, 1, 1], [], []>} : vector<8x128xf32>, vector<128x128xf32>, vector<8x128xf32> -> vector<8x128xf32>
    %c0_3 = arith.constant 0 : index
    %c0_4 = arith.constant 0 : index
    %3 = vector.load %arg4[%c0_3, %c0_4] : memref<1x128xf32, #tpu.memory_space<vmem>>, vector<1x128xf32>
    %4 = vector.broadcast %3 : vector<1x128xf32> to vector<8x128xf32>
    %5 = arith.addf %2, %4 : vector<8x128xf32>
    %cst_5 = arith.constant 0.000000e+00 : f32
    %6 = vector.broadcast %cst_5 : f32 to vector<8x128xf32>
    %7 = arith.maximumf %5, %6 : vector<8x128xf32>
    %c0_6 = arith.constant 0 : index
    %c0_7 = arith.constant 0 : index
    %8 = vector.load %arg5[%c0_6, %c0_7] : memref<128x128xf32, #tpu.memory_space<vmem>>, vector<128x128xf32>
    %cst_8 = arith.constant dense<0.000000e+00> : vector<8x128xf32>
    %9 = tpu.matmul %7, %8, %cst_8 {dimension_numbers = #tpu.dot_dimension_numbers<[1], [0], [0], [1], [0, 0, 1, 1], [], []>} : vector<8x128xf32>, vector<128x128xf32>, vector<8x128xf32> -> vector<8x128xf32>
    %c0_9 = arith.constant 0 : index
    %c0_10 = arith.constant 0 : index
    %10 = vector.load %arg6[%c0_9, %c0_10] : memref<1x128xf32, #tpu.memory_space<vmem>>, vector<1x128xf32>
    %11 = vector.broadcast %10 : vector<1x128xf32> to vector<8x128xf32>
    %12 = arith.addf %9, %11 : vector<8x128xf32>
    %cst_11 = arith.constant 0.000000e+00 : f32
    %13 = vector.broadcast %cst_11 : f32 to vector<8x128xf32>
    %14 = arith.maximumf %12, %13 : vector<8x128xf32>
    %c0_12 = arith.constant 0 : index
    %c0_13 = arith.constant 0 : index
    %15 = vector.load %arg2[%c0_12, %c0_13] : memref<8x128xi32, #tpu.memory_space<vmem>>, vector<8x128xi32>
    %c858993459_i32 = arith.constant 858993459 : i32
    %16 = vector.broadcast %c858993459_i32 : i32 to vector<8x128xi32>
    %17 = arith.cmpi uge, %15, %16 : vector<8x128xi32>
    %cst_14 = arith.constant 1.250000e+00 : f32
    %18 = vector.broadcast %cst_14 : f32 to vector<8x128xf32>
    %19 = arith.mulf %14, %18 : vector<8x128xf32>
    %cst_15 = arith.constant 0.000000e+00 : f32
    %20 = vector.broadcast %cst_15 : f32 to vector<8x128xf32>
    %21 = arith.select %17, %19, %20 : vector<8x128xi1>, vector<8x128xf32>
    %c0_16 = arith.constant 0 : index
    %c0_17 = arith.constant 0 : index
    %22 = vector.load %arg7[%c0_16, %c0_17] : memref<128x128xf32, #tpu.memory_space<vmem>>, vector<128x128xf32>
    %cst_18 = arith.constant dense<0.000000e+00> : vector<8x128xf32>
    %23 = tpu.matmul %21, %22, %cst_18 {dimension_numbers = #tpu.dot_dimension_numbers<[1], [0], [0], [1], [0, 0, 1, 1], [], []>} : vector<8x128xf32>, vector<128x128xf32>, vector<8x128xf32> -> vector<8x128xf32>
    %c0_19 = arith.constant 0 : index
    %c0_20 = arith.constant 0 : index
    %24 = vector.load %arg8[%c0_19, %c0_20] : memref<1x128xf32, #tpu.memory_space<vmem>>, vector<1x128xf32>
    %25 = vector.broadcast %24 : vector<1x128xf32> to vector<8x128xf32>
    %26 = arith.addf %23, %25 : vector<8x128xf32>
    %c0_21 = arith.constant 0 : index
    %c0_22 = arith.constant 0 : index
    %27 = vector.load %arg9[%c0_21, %c0_22] : memref<8x128xf32, #tpu.memory_space<vmem>>, vector<8x128xf32>
    tpu.vector_store %arg9[%c0_21, %c0_22], %26 {strides = array<i32>} : memref<8x128xf32, #tpu.memory_space<vmem>>, vector<8x128xf32>,
    return
  }
  func.func @transform_0(%arg0: i32) -> (i32, i32) {
    %c0_i32 = arith.constant 0 : i32
    %c0_i32_0 = arith.constant 0 : i32
    return %arg0, %c0_i32 : i32, i32
  }
  func.func @transform_1(%arg0: i32) -> (i32, i32) {
    %c0_i32 = arith.constant 0 : i32
    %c0_i32_0 = arith.constant 0 : i32
    return %arg0, %c0_i32 : i32, i32
  }
  func.func @transform_2(%arg0: i32) -> (i32, i32) {
    %c0_i32 = arith.constant 0 : i32
    %c0_i32_0 = arith.constant 0 : i32
    %c0_i32_1 = arith.constant 0 : i32
    return %c0_i32, %c0_i32_0 : i32, i32
  }
  func.func @transform_3(%arg0: i32) -> (i32, i32) {
    %c0_i32 = arith.constant 0 : i32
    %c0_i32_0 = arith.constant 0 : i32
    %c0_i32_1 = arith.constant 0 : i32
    return %c0_i32, %c0_i32_0 : i32, i32
  }
  func.func @transform_4(%arg0: i32) -> (i32, i32) {
    %c0_i32 = arith.constant 0 : i32
    %c0_i32_0 = arith.constant 0 : i32
    %c0_i32_1 = arith.constant 0 : i32
    return %c0_i32, %c0_i32_0 : i32, i32
  }
  func.func @transform_5(%arg0: i32) -> (i32, i32) {
    %c0_i32 = arith.constant 0 : i32
    %c0_i32_0 = arith.constant 0 : i32
    %c0_i32_1 = arith.constant 0 : i32
    return %c0_i32, %c0_i32_0 : i32, i32
  }
  func.func @transform_6(%arg0: i32) -> (i32, i32) {
    %c0_i32 = arith.constant 0 : i32
    %c0_i32_0 = arith.constant 0 : i32
    %c0_i32_1 = arith.constant 0 : i32
    return %c0_i32, %c0_i32_0 : i32, i32
  }
  func.func @transform_7(%arg0: i32) -> (i32, i32) {
    %c0_i32 = arith.constant 0 : i32
    %c0_i32_0 = arith.constant 0 : i32
    %c0_i32_1 = arith.constant 0 : i32
    return %c0_i32, %c0_i32_0 : i32, i32
  }
  func.func @transform_8(%arg0: i32) -> (i32, i32) {
    %c0_i32 = arith.constant 0 : i32
    %c0_i32_0 = arith.constant 0 : i32
    return %arg0, %c0_i32 : i32, i32
  }
}

</mosaic_0001>

<bundles_post_ra>
// kernel: iris_classifier_forward.1
= control target key start
LH: loop header
LB: loop body
LE: loop exit
PB: predicated region body
PF: predicated region fallthrough
CT: control target
= control target key end

     0   :  { %13 = vsyncpa [#allocation3], 0  ;;  %s826_s0 = inlined_call_operand.vmem [shape: f32[8,128], index: 0, kind: input, shape index: {}]   ;;  %s827_s1 = inlined_call_operand.vmem [shape: u32[8,128], index: 1, kind: input, shape index: {}]   ;;  %s828_s2 = inlined_call_operand.hbm [shape: f32[128,128], index: 2, kind: input, shape index: {}]   ;;  %s829_s3 = inlined_call_operand.vmem [shape: f32[1,128], index: 3, kind: input, shape index: {}]   ;;  %s830_s4 = inlined_call_operand.hbm [shape: f32[128,128], index: 4, kind: input, shape index: {}]   ;;  %s831_s5 = inlined_call_operand.vmem [shape: f32[1,128], index: 5, kind: input, shape index: {}]   ;;  %s832_s6 = inlined_call_operand.hbm [shape: f32[128,128], index: 6, kind: input, shape index: {}]   ;;  %s833_s7 = inlined_call_operand.vmem [shape: f32[1,128], index: 7, kind: input, shape index: {}]   ;;  %s834_s8 = inlined_call_operand.vmem [shape: f32[8,128], index: 8, kind: output, shape index: {}]  }
   0x1   :  { %14 = vsyncpa [#allocation5], 0  ;;  %s673_s27 = smov [#allocation4]   ;;  %s674_s29 = smov [#allocation2]  }
   0x2   :  { %s38_s28 = sshll.u32 %s673_s27, 4  ;;  %s24_s30 = sshll.u32 %s674_s29, 4  ;;  %s39_s28 = int_to_ptr.vmem [resolvable:$true] %s38_s28  ;;  %s726_s30 = int_to_ptr.vmem [resolvable:$true] %s24_s30 }
   0x3   :  { %s603_s11 = scalar_lea.hbm %s830_s4, 2048 }
   0x4   :  { %p604_p0 = scmp.ne.s32.totalorder %s830_s4, %s603_s11  ;;  %p607_p1 = scmp.lt.u32.totalorder %s603_s11, %s830_s4 }
   0x6   :  { %p609_p2 = pnand %p607_p1, %p604_p0 }
   0x8   :  { %612 = shalt.err (!%p609_p2)
}
   0x9   :  { %s613_s16 = scalar_lea.vmem %s39_s28, 2048  ;;  %p618_p4 = scmp.lt.s32.totalorder %s39_s28, %s39_s28 }
   0xa   :  { %p614_p3 = scmp.ne.s32.totalorder %s39_s28, %s613_s16  ;;  %p619_p5 = scmp.lt.s32.totalorder %s613_s16, %s613_s16 }
   0xc   :  { %p620_p6 = por %p619_p5, %p618_p4 }
   0xe   :  { %p621_p7 = pnand %p620_p6, %p614_p3 }
  0x10   :  { %624 = shalt.err (!%p621_p7)
}
  0x11   :  { %s675_s17 = smov 128   ;;  %s676_s18 = smov 8  }
  0x12   :  { %44 = dma.hbm_to_vmem [thread:$0]  %s830_s4, 2048, %s39_s28, [#allocation5], %s675_s17, %s675_s17, %s676_s18  }
  0x13   :  { %s625_s23 = scalar_lea.hbm %s828_s2, 2048 }
  0x14   :  { %p626_p8 = scmp.ne.s32.totalorder %s828_s2, %s625_s23  ;;  %p629_p9 = scmp.lt.u32.totalorder %s625_s23, %s828_s2 }
  0x16   :  { %p631_p10 = pnand %p629_p9, %p626_p8 }
  0x18   :  { %634 = shalt.err (!%p631_p10)
}
  0x19   :  { %s635_s29 = scalar_lea.vmem %s726_s30, 2048  ;;  %p640_p12 = scmp.lt.s32.totalorder %s726_s30, %s726_s30 }
  0x1a   :  { %p636_p11 = scmp.ne.s32.totalorder %s726_s30, %s635_s29  ;;  %p641_p13 = scmp.lt.s32.totalorder %s635_s29, %s635_s29 }
  0x1c   :  { %p642_p0 = por %p641_p13, %p640_p12 }
  0x1e   :  { %p643_p1 = pnand %p642_p0, %p636_p11 }
  0x20   :  { %646 = shalt.err (!%p643_p1)
}
  0x21   :  { %30 = dma.hbm_to_vmem [thread:$0]  %s828_s2, 2048, %s726_s30, [#allocation3], %s675_s17, %s675_s17, %s676_s18  }
  0x22   :  { %s677_s9 = smov [#allocation6]   ;;  %s647_s13 = scalar_lea.hbm %s832_s6, 2048 }
  0x23   :  { %s52_s10 = sshll.u32 %s677_s9, 4  ;;  %p648_p2 = scmp.ne.s32.totalorder %s832_s6, %s647_s13  ;;  %s53_s10 = int_to_ptr.vmem [resolvable:$true] %s52_s10 }
  0x24   :  { %p651_p3 = scmp.lt.u32.totalorder %s647_s13, %s832_s6 }
  0x26   :  { %p653_p4 = pnand %p651_p3, %p648_p2 }
  0x28   :  { %656 = shalt.err (!%p653_p4)
}
  0x29   :  { %s657_s20 = scalar_lea.vmem %s53_s10, 2048  ;;  %p662_p6 = scmp.lt.s32.totalorder %s53_s10, %s53_s10 }
  0x2a   :  { %p658_p5 = scmp.ne.s32.totalorder %s53_s10, %s657_s20  ;;  %p663_p7 = scmp.lt.s32.totalorder %s657_s20, %s657_s20 }
  0x2c   :  { %p664_p8 = por %p663_p7, %p662_p6 }
  0x2e   :  { %p665_p9 = pnand %p664_p8, %p658_p5 }
  0x30   :  { %668 = shalt.err (!%p665_p9)
}
  0x31   :  { %58 = dma.hbm_to_vmem [thread:$0]  %s832_s6, 2048, %s53_s10, [#allocation5], %s675_s17, %s675_s17, %s676_s18  }
  0x32   :  { %669 = dma.done.wait [#allocation3], 2048  }
  0x33   :  { %670 = vsyncadd [#allocation3], 4294965248 }
  0x34   :  { %671 = dma.done.wait [#allocation5], 4096  }
  0x35   :  { %672 = vsyncadd [#allocation5], 4294963200  ;;  %v678_v0 = vmov 0.0|0.0   ;;  %vm679_vm0 = vmmov 0   ;;  %v680_v1 = vmov 0.0   ;;  %v71_v2 = vld [vmem:[#allocation2] sm:$0xff] }
  0x36   :  { %523 = vmatprep.subr.bf16.mxu0 %v678_v0  ;;  %450 = vmatprep.mubr.msk.f32.mxu0 %vm679_vm0, %v680_v1  ;;  %v72_v3 = vld [vmem:[#allocation2 + $0x8] sm:$0xff]  ;;  %v73_v4 = vld [vmem:[#allocation2 + $0x10] sm:$0xff]  ;;  %v74_v6 = vld [vmem:[#allocation2 + $0x18] sm:$0xff] }
  0x37   :  { %547 = vmatprep.subr.bf16.mxu1 %v678_v0  ;;  %485 = vmatprep.mubr.msk.f32.mxu1 %vm679_vm0, %v680_v1  ;;  %v524_v5 = vpack.c.bf16 %v72_v3, %v71_v2  ;;  %v527_v7 = vpack.c.bf16 %v74_v6, %v73_v4  ;;  %v75_v8 = vld [vmem:[#allocation2 + $0x20] sm:$0xff]  ;;  %v76_v9 = vld [vmem:[#allocation2 + $0x28] sm:$0xff]  ;;  %v167_v12 = vld [vmem:[#allocation4 + $0x10] sm:$0xff] }
  0x38   :  { %v165_v10 = vld [vmem:[#allocation4] sm:$0xff]  ;;  %v166_v11 = vld [vmem:[#allocation4 + $0x8] sm:$0xff]  ;;  %v168_v13 = vld [vmem:[#allocation4 + $0x18] sm:$0xff]  ;;  %v530_v14 = vpack.c.bf16 %v76_v9, %v75_v8 }
  0x39   :  { %525 = vmatpush3.bf16.msra.mxu0 %v524_v5  ;;  %v548_v15 = vpack.c.bf16 %v166_v11, %v165_v10  ;;  %v77_v16 = vld [vmem:[#allocation2 + $0x30] sm:$0xff]  ;;  %v78_v17 = vld [vmem:[#allocation2 + $0x38] sm:$0xff]  ;;  %v551_v18 = vpack.c.bf16 %v168_v13, %v167_v12  ;;  %v169_v19 = vld [vmem:[#allocation4 + $0x20] sm:$0xff] }
  0x3a   :  { %526 = vmatprep.subr.bf16.mxu0 %v678_v0  ;;  %v170_v20 = vld [vmem:[#allocation4 + $0x28] sm:$0xff]  ;;  %v533_v21 = vpack.c.bf16 %v78_v17, %v77_v16  ;;  %v79_v22 = vld [vmem:[#allocation2 + $0x40] sm:$0xff]  ;;  %v171_v25 = vld [vmem:[#allocation4 + $0x30] sm:$0xff] }
  0x3b   :  { %549 = vmatpush3.bf16.msra.mxu1 %v548_v15  ;;  %v80_v23 = vld [vmem:[#allocation2 + $0x48] sm:$0xff]  ;;  %v554_v24 = vpack.c.bf16 %v170_v20, %v169_v19  ;;  %v172_v26 = vld [vmem:[#allocation4 + $0x38] sm:$0xff]  ;;  %v81_v28 = vld [vmem:[#allocation2 + $0x50] sm:$0xff] }
  0x3c   :  { %550 = vmatprep.subr.bf16.mxu1 %v678_v0  ;;  %v536_v27 = vpack.c.bf16 %v80_v23, %v79_v22  ;;  %v82_v29 = vld [vmem:[#allocation2 + $0x58] sm:$0xff]  ;;  %v557_v30 = vpack.c.bf16 %v172_v26, %v171_v25  ;;  %v173_v31 = vld [vmem:[#allocation4 + $0x40] sm:$0xff]  ;;  %v174_v32 = vld [vmem:[#allocation4 + $0x48] sm:$0xff] }
  0x3d   :  { %528 = vmatpush3.bf16.msra.mxu0 %v527_v7  ;;  %v539_v33 = vpack.c.bf16 %v82_v29, %v81_v28  ;;  %v83_v34 = vld [vmem:[#allocation2 + $0x60] sm:$0xff]  ;;  %v84_v35 = vld [vmem:[#allocation2 + $0x68] sm:$0xff]  ;;  %v560_v36 = vpack.c.bf16 %v174_v32, %v173_v31  ;;  %v175_v37 = vld [vmem:[#allocation4 + $0x50] sm:$0xff] }
  0x3e   :  { %529 = vmatprep.subr.bf16.mxu0 %v678_v0  ;;  %v176_v38 = vld [vmem:[#allocation4 + $0x58] sm:$0xff]  ;;  %v542_v39 = vpack.c.bf16 %v84_v35, %v83_v34  ;;  %v85_v40 = vld [vmem:[#allocation2 + $0x70] sm:$0xff]  ;;  %v177_v43 = vld [vmem:[#allocation4 + $0x60] sm:$0xff] }
  0x3f   :  { %552 = vmatpush3.bf16.msra.mxu1 %v551_v18  ;;  %v86_v41 = vld [vmem:[#allocation2 + $0x78] sm:$0xff]  ;;  %v563_v42 = vpack.c.bf16 %v176_v38, %v175_v37  ;;  %v178_v44 = vld [vmem:[#allocation4 + $0x68] sm:$0xff]  ;;  %v70_v47 = vld [vmem:[%s826_s0] sm:$0xff] }
  0x40   :  { %553 = vmatprep.subr.bf16.mxu1 %v678_v0  ;;  %v545_v45 = vpack.c.bf16 %v86_v41, %v85_v40  ;;  %v566_v46 = vpack.c.bf16 %v178_v44, %v177_v43  ;;  %v179_v48 = vld [vmem:[#allocation4 + $0x70] sm:$0xff]  ;;  %v180_v49 = vld [vmem:[#allocation4 + $0x78] sm:$0xff]  ;;  %v263_v51 = vld [vmem:[#allocation6] sm:$0xff] }
  0x41   :  { %531 = vmatpush3.bf16.msra.mxu0 %v530_v14  ;;  %v569_v50 = vpack.c.bf16 %v180_v49, %v179_v48  ;;  %v264_v52 = vld [vmem:[#allocation6 + $0x8] sm:$0xff]  ;;  %v265_v53 = vld [vmem:[#allocation6 + $0x10] sm:$0xff]  ;;  %v266_v55 = vld [vmem:[#allocation6 + $0x18] sm:$0xff] }
  0x42   :  { %532 = vmatprep.subr.bf16.mxu0 %v678_v0  ;;  %v572_v54 = vpack.c.bf16 %v264_v52, %v263_v51  ;;  %v575_v56 = vpack.c.bf16 %v266_v55, %v265_v53  ;;  %v267_v57 = vld [vmem:[#allocation6 + $0x20] sm:$0xff]  ;;  %v268_v58 = vld [vmem:[#allocation6 + $0x28] sm:$0xff]  ;;  %v269_v60 = vld [vmem:[#allocation6 + $0x30] sm:$0xff] }
  0x43   :  { %555 = vmatpush3.bf16.msra.mxu1 %v554_v24  ;;  %v578_v59 = vpack.c.bf16 %v268_v58, %v267_v57  ;;  %v270_v61 = vld [vmem:[#allocation6 + $0x38] sm:$0xff]  ;;  %v271_v63 = vld [vmem:[#allocation6 + $0x40] sm:$0xff]  ;;  %v273_v3 = vld [vmem:[#allocation6 + $0x50] sm:$0xff] }
  0x44   :  { %556 = vmatprep.subr.bf16.mxu1 %v678_v0  ;;  %v581_v62 = vpack.c.bf16 %v270_v61, %v269_v60  ;;  %v274_v4 = vld [vmem:[#allocation6 + $0x58] sm:$0xff]  ;;  %v363_v6 = vld [vmem:[%s829_s3] ss:$0 sm:$0xff]  ;;  %v276_v12 = vld [vmem:[#allocation6 + $0x68] sm:$0xff] }
  0x45   :  { %534 = vmatpush3.bf16.msra.mxu0 %v533_v21  ;;  %v587_v5 = vpack.c.bf16 %v274_v4, %v273_v3  ;;  %v275_v11 = vld [vmem:[#allocation6 + $0x60] sm:$0xff]  ;;  %v277_v14 = vld [vmem:[#allocation6 + $0x70] sm:$0xff]  ;;  %v278_v15 = vld [vmem:[#allocation6 + $0x78] sm:$0xff] }
  0x46   :  { %535 = vmatprep.subr.bf16.mxu0 %v678_v0  ;;  %v590_v13 = vpack.c.bf16 %v276_v12, %v275_v11  ;;  %v593_v16 = vpack.c.bf16 %v278_v15, %v277_v14  ;;  %v364_v17 = vld [vmem:[%s831_s5] ss:$0 sm:$0xff] }
  0x47   :  { %558 = vmatpush3.bf16.msra.mxu1 %v557_v30  ;;  %v259_v21 = vld [vmem:[%s827_s1] sm:$0xff] }
  0x48   :  { %559 = vmatprep.subr.bf16.mxu1 %v678_v0  ;;  %vm260_vm1 = vcmp.ge.u32.totalorder %v259_v21, 858993459 }
  0x49   :  { %537 = vmatpush3.bf16.msra.mxu0 %v536_v27 }
  0x4a   :  { %538 = vmatprep.subr.bf16.mxu0 %v678_v0 }
  0x4b   :  { %561 = vmatpush3.bf16.msra.mxu1 %v560_v36 }
  0x4c   :  { %562 = vmatprep.subr.bf16.mxu1 %v678_v0 }
  0x4d   :  { %540 = vmatpush3.bf16.msra.mxu0 %v539_v33 }
  0x4e   :  { %541 = vmatprep.subr.bf16.mxu0 %v678_v0 }
  0x4f   :  { %564 = vmatpush3.bf16.msra.mxu1 %v563_v42 }
  0x50   :  { %565 = vmatprep.subr.bf16.mxu1 %v678_v0 }
  0x51   :  { %543 = vmatpush3.bf16.msra.mxu0 %v542_v39 }
  0x52   :  { %544 = vmatprep.subr.bf16.mxu0 %v678_v0 }
  0x53   :  { %567 = vmatpush3.bf16.msra.mxu1 %v566_v46 }
  0x54   :  { %568 = vmatprep.subr.bf16.mxu1 %v678_v0 }
  0x55   :  { %546 = vmatpush3.bf16.msra.mxu0 %v545_v45 }
  0x56   :  { %571 = vmatprep.subr.bf16.mxu0 %v678_v0 }
  0x57   :  { %570 = vmatpush3.bf16.msra.mxu1 %v569_v50 }
  0x58   :  { %451 = vmatmul.mubr.f32.vlgmr.msra.gmra.mrb[0].mxu0 %v70_v47 }
  0x59   :  { %520 = vmatprep.mubr.msk.f32.mxu0 %vm679_vm0, %v680_v1  ;;  %573 = vmatpush3.bf16.msra.mxu0 %v572_v54  ;;  %v272_v1 = vld [vmem:[#allocation6 + $0x48] sm:$0xff] }
  0x5a   :  { %574 = vmatprep.subr.bf16.mxu0 %v678_v0  ;;  %v584_v2 = vpack.c.bf16 %v272_v1, %v271_v63 }
  0x5d   :  { %576 = vmatpush3.bf16.msra.mxu0 %v575_v56 }
  0x5e   :  { %577 = vmatprep.subr.bf16.mxu0 %v678_v0 }
  0x61   :  { %579 = vmatpush3.bf16.msra.mxu0 %v578_v59 }
  0x62   :  { %580 = vmatprep.subr.bf16.mxu0 %v678_v0 }
  0x65   :  { %582 = vmatpush3.bf16.msra.mxu0 %v581_v62 }
  0x66   :  { %583 = vmatprep.subr.bf16.mxu0 %v678_v0 }
  0x69   :  { %585 = vmatpush3.bf16.msra.mxu0 %v584_v2 }
  0x6a   :  { %586 = vmatprep.subr.bf16.mxu0 %v678_v0 }
  0x6d   :  { %588 = vmatpush3.bf16.msra.mxu0 %v587_v5 }
  0x6e   :  { %589 = vmatprep.subr.bf16.mxu0 %v678_v0 }
  0x71   :  { %591 = vmatpush3.bf16.msra.mxu0 %v590_v13 }
  0x72   :  { %592 = vmatprep.subr.bf16.mxu0 %v678_v0  ;;  %v365_v0 = vld [vmem:[%s833_s7] ss:$0 sm:$0xff] }
  0x75   :  { %594 = vmatpush3.bf16.msra.mxu0 %v593_v16 }
 0x12b   :  { %v160_v7 = vpop.f32.mrb[0].mxu0 }
 0x12c   :  { %v161_v8 = vadd.f32 %v363_v6, %v160_v7  ;;  %v452_v9 = vpop.f32.mrb[1].mxu0 }
 0x12e   :  { %v164_v10 = vmax.f32 %v161_v8, 0.0 }
 0x130   :  { %486 = vmatmul.mubr.f32.vlgmr.msra.gmra.mrb[0].mxu1 %v164_v10 }
 0x203   :  { %v254_v18 = vpop.f32.mrb[0].mxu1 }
 0x204   :  { %v255_v19 = vadd.f32 %v364_v17, %v254_v18  ;;  %v487_v20 = vpop.f32.mrb[1].mxu1 }
 0x206   :  { %v258_v22 = vmax.f32 %v255_v19, 0.0 }
 0x208   :  { %v261_v23 = vmul.f32 1.25, %v258_v22 }
 0x20a   :  { %521 = vmatmul.mubr.msk.f32.vlgmr.msra.gmra.mrb[2].mxu0 %vm260_vm1, %v261_v23 }
 0x2dd   :  { %v352_v24 = vpop.f32.mrb[2].mxu0 }
 0x2de   :  { %v353_v25 = vadd.f32 %v365_v0, %v352_v24  ;;  %v522_v26 = vpop.f32.mrb[3].mxu0 }
 0x2e0   :  { %356 = vst [vmem:[%s834_s8] sm:$0xff] %v353_v25 }
 0x2e1   :  { %361 = vsyncpa [#allocation3], 1 }
 0x2e2   :  { %362 = vsyncpa [#allocation5], 1 }

</bundles_post_ra>
